<compile_context>
chip_gen: v7x
topology: tpu7x:2x2x1
jax: 0.10.0
libtpu: 0.0.40
codegen_flags: <defaults>
</compile_context>

<pallas_src>
import functools

import jax
import jax.numpy as jnp
from jax.experimental import pallas as pl
from jax.experimental.pallas import tpu as pltpu


# ---------------------------------------------------------------------------
# Padded (lane-dense) sizes
# ---------------------------------------------------------------------------
K_PAD = 128   # im2col contraction dim: 27 * C = 81 -> 128
F_PAD = 128   # hidden width padded to a full lane tile
C_PAD = 128   # num_classes padded to a full lane tile


def _round_up(x, m):
    return ((x + m - 1) // m) * m


def _pad_to(x, shape):
    return jnp.pad(x, [(0, s - d) for d, s in zip(x.shape, shape)])


# ---------------------------------------------------------------------------
# Kernel 1: fused conv-stem (matmul + bias + relu) + pooling-as-matmul
# ---------------------------------------------------------------------------
def _stem_pool_kernel(p_ref, w_ref, b_ref, pmap_ref, out_ref):
    m = pl.program_id(1)

    # bf16 MXU matmul, f32 accumulation, f32 bias + relu epilogue
    feat = jnp.dot(p_ref[0], w_ref[0], preferred_element_type=jnp.float32)
    feat = jnp.maximum(feat + b_ref[0], 0.0)                  # [TM, F_PAD] f32

    # global mean + 2x2 SPP region means for this M-tile as one matmul
    part = jnp.dot(pmap_ref[...], feat,
                   preferred_element_type=jnp.float32)        # [P_PAD, F_PAD]

    @pl.when(m == 0)
    def _init():
        out_ref[...] = jnp.zeros_like(out_ref)

    out_ref[...] += part[None, :, :]


def fused_stem_pool(patches_all, stem_w_all, stem_b_all, pool_map_t, *, tm):
    S, M, Kp = patches_all.shape                  # S = 2 streams
    P_pad = pool_map_t.shape[0]
    n_m = M // tm
    return pl.pallas_call(
        _stem_pool_kernel,
        out_shape=jax.ShapeDtypeStruct((S, P_pad, F_PAD), jnp.float32),
        grid_spec=pl.GridSpec(
            grid=(S, n_m),
            in_specs=[
                pl.BlockSpec((1, tm, Kp), lambda s, m: (s, m, 0)),
                pl.BlockSpec((1, Kp, F_PAD), lambda s, m: (s, 0, 0)),
                pl.BlockSpec((1, 1, F_PAD), lambda s, m: (s, 0, 0)),
                pl.BlockSpec((P_pad, tm), lambda s, m: (0, m)),
            ],
            out_specs=pl.BlockSpec((1, P_pad, F_PAD), lambda s, m: (s, 0, 0)),
        ),
        compiler_params=pltpu.CompilerParams(
            dimension_semantics=("parallel", "arbitrary"),
            vmem_limit_bytes=48 * 1024 * 1024,
        ),
    )(patches_all, stem_w_all, stem_b_all, pool_map_t)


# ---------------------------------------------------------------------------
# Kernel 2: both streams' FC heads + ensemble average, single launch
# ---------------------------------------------------------------------------
def _head_ensemble_kernel(pooled_ref, fcw_ref, fcb_ref, pfcw_ref, pfcb_ref,
                          pred_ref, pscore_ref, *, batch, patch_off):
    pooled = pooled_ref[...].astype(jnp.bfloat16)   # [2, P_PAD, F_PAD]

    def head(s):
        g = pooled[s]                               # [P_PAD, F_PAD]
        sc_fc = jnp.dot(g, fcw_ref[s],
                        preferred_element_type=jnp.float32) + fcb_ref[s]
        sc_p = jnp.dot(g, pfcw_ref[s],
                       preferred_element_type=jnp.float32) + pfcb_ref[s]
        return sc_fc, sc_p

    fc_rgb, p_rgb = head(0)
    fc_dep, p_dep = head(1)

    # ensemble average fused with the head matmuls
    pred_ref[...] = 0.5 * (fc_rgb[:batch] + fc_dep[:batch])
    pscore_ref[...] = 0.5 * (p_rgb[patch_off:patch_off + 4 * batch] +
                             p_dep[patch_off:patch_off + 4 * batch])


def fused_head_ensemble(pooled, fc_w, fc_b, pfc_w, pfc_b, *, batch, patch_off):
    S, P_pad, _ = pooled.shape
    return pl.pallas_call(
        functools.partial(_head_ensemble_kernel,
                          batch=batch, patch_off=patch_off),
        out_shape=(jax.ShapeDtypeStruct((batch, C_PAD), jnp.float32),
                   jax.ShapeDtypeStruct((4 * batch, C_PAD), jnp.float32)),
        grid_spec=pl.GridSpec(
            grid=(1,),
            in_specs=[
                pl.BlockSpec((S, P_pad, F_PAD), lambda i: (0, 0, 0)),
                pl.BlockSpec((S, F_PAD, C_PAD), lambda i: (0, 0, 0)),
                pl.BlockSpec((S, 1, C_PAD), lambda i: (0, 0, 0)),
                pl.BlockSpec((S, F_PAD, C_PAD), lambda i: (0, 0, 0)),
                pl.BlockSpec((S, 1, C_PAD), lambda i: (0, 0, 0)),
            ],
            out_specs=(
                pl.BlockSpec((batch, C_PAD), lambda i: (0, 0)),
                pl.BlockSpec((4 * batch, C_PAD), lambda i: (0, 0)),
            ),
        ),
        compiler_params=pltpu.CompilerParams(
            dimension_semantics=("arbitrary",),
        ),
    )(pooled, fc_w, fc_b, pfc_w, pfc_b)


# ---------------------------------------------------------------------------
# JAX glue: im2col for the 3D conv stem, pooling matrix, parameter packing
# ---------------------------------------------------------------------------
def extract_patches_3d(x, ksize=(3, 3, 3), strides=(1, 2, 2), pad=(1, 1, 1)):
    # x: [B, T, H, W, C]  (bf16)
    # TODO(synk): at real I3D resolutions, move patch extraction inside the
    #             Pallas kernel (DMA raw x tile + static shifted slices) to
    #             avoid the 27x im2col HBM blow-up.
    B, T, H, W, C = x.shape
    kt, kh, kw = ksize
    st, sh, sw = strides
    xp = jnp.pad(x, ((0, 0), (pad[0],) * 2, (pad[1],) * 2, (pad[2],) * 2,
                     (0, 0)))
    To = (T + 2 * pad[0] - kt) // st + 1
    Ho = (H + 2 * pad[1] - kh) // sh + 1
    Wo = (W + 2 * pad[2] - kw) // sw + 1
    slices = []
    for dt in range(kt):
        for dh in range(kh):
            for dw in range(kw):
                slices.append(xp[:, dt:dt + To * st:st,
                                 dh:dh + Ho * sh:sh,
                                 dw:dw + Wo * sw:sw, :])
    patches = jnp.stack(slices, axis=-2)            # [B,To,Ho,Wo,27,C]
    patches = patches.reshape(B, To, Ho, Wo, kt * kh * kw * C)
    return patches, (To, Ho, Wo)


def build_pool_map_t(B, To, Ho, Wo, patch_off, P_pad):
    """[P_pad, M] matrix: rows 0..B-1 = global means, rows patch_off+b*4+reg =
    2x2 SPP region means (reg = 2*(h//ph) + (w//pw))."""
    ph, pw = Ho // 2, Wo // 2
    M = B * To * Ho * Wo
    r = jnp.arange(M)
    b_idx = r // (To * Ho * Wo)
    h_idx = (r // Wo) % Ho
    w_idx = r % Wo
    reg = 2 * (h_idx // ph) + (w_idx // pw)
    pm = jnp.zeros((P_pad, M), jnp.float32)
    pm = pm.at[b_idx, r].set(1.0 / (To * Ho * Wo))
    pm = pm.at[patch_off + b_idx * 4 + reg, r].set(1.0 / (To * ph * pw))
    return pm


def init_stream_params(key, c_in, hidden, num_classes, ksize=(3, 3, 3)):
    kt, kh, kw = ksize
    K = kt * kh * kw * c_in
    k1, k2, k3 = jax.random.split(key, 3)
    return {
        "stem_w": jax.random.normal(k1, (K, hidden), jnp.float32) * 0.05,
        "stem_b": jnp.zeros((hidden,), jnp.float32),
        "fc_w": jax.random.normal(k2, (hidden, num_classes), jnp.float32) * 0.05,
        "fc_b": jnp.zeros((num_classes,), jnp.float32),
        "patch_fc_w": jax.random.normal(k3, (hidden, num_classes),
                                        jnp.float32) * 0.05,
        "patch_fc_b": jnp.zeros((num_classes,), jnp.float32),
    }


def pack_stream_params(params_list):
    """Stack rgb/depth params on a leading axis of 2, zero-padded lane-dense,
    weights in bf16, biases in f32."""
    stem_w = jnp.stack([_pad_to(p["stem_w"], (K_PAD, F_PAD))
                        for p in params_list]).astype(jnp.bfloat16)
    stem_b = jnp.stack([_pad_to(p["stem_b"][None, :], (1, F_PAD))
                        for p in params_list])
    fc_w = jnp.stack([_pad_to(p["fc_w"], (F_PAD, C_PAD))
                      for p in params_list]).astype(jnp.bfloat16)
    fc_b = jnp.stack([_pad_to(p["fc_b"][None, :], (1, C_PAD))
                      for p in params_list])
    pfc_w = jnp.stack([_pad_to(p["patch_fc_w"], (F_PAD, C_PAD))
                       for p in params_list]).astype(jnp.bfloat16)
    pfc_b = jnp.stack([_pad_to(p["patch_fc_b"][None, :], (1, C_PAD))
                       for p in params_list])
    return stem_w, stem_b, fc_w, fc_b, pfc_w, pfc_b


# ---------------------------------------------------------------------------
# Ensemble forward (matches PyTorch Ensemble.forward semantics)
# ---------------------------------------------------------------------------
def ensemble_forward(rgb_batch, depth_batch, rgb_params, depth_params,
                     num_classes):
    B = rgb_batch.shape[0]

    # im2col (bf16) for both streams, stacked on a leading stream axis
    pr, (To, Ho, Wo) = extract_patches_3d(rgb_batch.astype(jnp.bfloat16))
    pd, _ = extract_patches_3d(depth_batch.astype(jnp.bfloat16))
    K = pr.shape[-1]
    M = B * To * Ho * Wo
    assert K <= K_PAD
    patches = jnp.stack([pr.reshape(M, K), pd.reshape(M, K)], axis=0)
    patches = _pad_to(patches, (2, M, K_PAD))

    # pooling matrix: patch rows start at a sublane-aligned offset
    patch_off = _round_up(B, 8)
    P_pad = _round_up(patch_off + 4 * B, 8)
    pool_map_t = build_pool_map_t(B, To, Ho, Wo, patch_off, P_pad)

    stem_w, stem_b, fc_w, fc_b, pfc_w, pfc_b = pack_stream_params(
        [rgb_params, depth_params])

    # stem + pooling (one pallas_call, both streams)
    tm = 256 if M % 256 == 0 else M
    pooled = fused_stem_pool(patches, stem_w, stem_b, pool_map_t, tm=tm)

    # heads + ensemble average (one pallas_call)
    pred_pad, pscore_pad = fused_head_ensemble(
        pooled, fc_w, fc_b, pfc_w, pfc_b, batch=B, patch_off=patch_off)

    pred = pred_pad[:, :num_classes]
    pred_score = pscore_pad.reshape(B, 4, C_PAD)[:, :, :num_classes]

    rgb_loss_dict = {}     # TODO(synk): original model returns aux losses
    depth_loss_dict = {}
    return pred, pred_score, rgb_loss_dict, depth_loss_dict


if __name__ == "__main__":
    B, T, H, W, C = 2, 4, 16, 16, 3
    hidden = 32
    num_classes = 60  # NTU RGB+D 60

    key = jax.random.PRNGKey(0)
    k_rgb_x, k_d_x, k_rgb_p, k_d_p = jax.random.split(key, 4)

    rgb_batch = jax.random.normal(k_rgb_x, (B, T, H, W, C), jnp.float32)
    depth_batch = jax.random.normal(k_d_x, (B, T, H, W, C), jnp.float32)

    rgb_params = init_stream_params(k_rgb_p, C, hidden, num_classes)
    depth_params = init_stream_params(k_d_p, C, hidden, num_classes)

    fwd = jax.jit(functools.partial(ensemble_forward, num_classes=num_classes))
    pred, pred_score, rgb_loss_dict, depth_loss_dict = fwd(
        rgb_batch, depth_batch, rgb_params, depth_params)

    jax.block_until_ready(pred)
    jax.block_until_ready(pred_score)
    assert pred.shape == (B, num_classes)
    assert pred_score.shape == (B, 4, num_classes)
    assert bool(jnp.all(jnp.isfinite(pred)))
    assert bool(jnp.all(jnp.isfinite(pred_score)))
    print("KERNEL_OK")
</pallas_src>

<mosaic_0001>
module attributes {stable_mosaic.version = 11 : i64} {
  func.func @_stem_pool_kernel(%arg0: i32, %arg1: i32, %arg2: memref<1x256x128xbf16, #tpu.memory_space<vmem>>, %arg3: memref<1x128x128xbf16, #tpu.memory_space<vmem>>, %arg4: memref<1x1x128xf32, #tpu.memory_space<vmem>>, %arg5: memref<16x256xf32, #tpu.memory_space<vmem>>, %arg6: memref<1x16x128xf32, #tpu.memory_space<vmem>>) attributes {dimension_semantics = [#tpu.dimension_semantics<parallel>, #tpu.dimension_semantics<arbitrary>], iteration_bounds = array<i64: 2, 2>, scalar_prefetch = 0 : i64, scratch_operands = 0 : i64, tpu.core_type = #tpu.core_type<tc>, window_params = [{transform_indices = @transform_0, window_bounds = array<i64: 1, 256, 128>}, {transform_indices = @transform_1, window_bounds = array<i64: 1, 128, 128>}, {transform_indices = @transform_2, window_bounds = array<i64: 1, 1, 128>}, {transform_indices = @transform_3, window_bounds = array<i64: 16, 256>}, {transform_indices = @transform_4, window_bounds = array<i64: 1, 16, 128>}]} {
    %c0 = arith.constant 0 : index
    %c0_0 = arith.constant 0 : index
    %c0_1 = arith.constant 0 : index
    %0 = vector.load %arg2[%c0, %c0_0, %c0_1] : memref<1x256x128xbf16, #tpu.memory_space<vmem>>, vector<1x256x128xbf16>
    %1 = vector.shape_cast %0 : vector<1x256x128xbf16> to vector<256x128xbf16>
    %c0_2 = arith.constant 0 : index
    %c0_3 = arith.constant 0 : index
    %c0_4 = arith.constant 0 : index
    %2 = vector.load %arg3[%c0_2, %c0_3, %c0_4] : memref<1x128x128xbf16, #tpu.memory_space<vmem>>, vector<1x128x128xbf16>
    %3 = vector.shape_cast %2 : vector<1x128x128xbf16> to vector<128x128xbf16>
    %cst = arith.constant dense<0.000000e+00> : vector<256x128xf32>
    %4 = tpu.matmul %1, %3, %cst {dimension_numbers = #tpu.dot_dimension_numbers<[1], [0], [0], [1], [0, 0, 1, 1], [], []>} : vector<256x128xbf16>, vector<128x128xbf16>, vector<256x128xf32> -> vector<256x128xf32>
    %c0_5 = arith.constant 0 : index
    %c0_6 = arith.constant 0 : index
    %c0_7 = arith.constant 0 : index
    %5 = vector.load %arg4[%c0_5, %c0_6, %c0_7] : memref<1x1x128xf32, #tpu.memory_space<vmem>>, vector<1x1x128xf32>
    %6 = vector.shape_cast %5 : vector<1x1x128xf32> to vector<1x128xf32>
    %7 = vector.broadcast %6 : vector<1x128xf32> to vector<256x128xf32>
    %8 = arith.addf %4, %7 : vector<256x128xf32>
    %cst_8 = arith.constant 0.000000e+00 : f32
    %9 = vector.broadcast %cst_8 : f32 to vector<256x128xf32>
    %10 = arith.maximumf %8, %9 : vector<256x128xf32>
    %c0_9 = arith.constant 0 : index
    %c0_10 = arith.constant 0 : index
    %11 = vector.load %arg5[%c0_9, %c0_10] : memref<16x256xf32, #tpu.memory_space<vmem>>, vector<16x256xf32>
    %cst_11 = arith.constant dense<0.000000e+00> : vector<16x128xf32>
    %12 = tpu.matmul %11, %10, %cst_11 {dimension_numbers = #tpu.dot_dimension_numbers<[1], [0], [0], [1], [0, 0, 1, 1], [], []>} : vector<16x256xf32>, vector<256x128xf32>, vector<16x128xf32> -> vector<16x128xf32>
    %c0_i32 = arith.constant 0 : i32
    %13 = arith.cmpi eq, %arg1, %c0_i32 : i32
    %14 = arith.extui %13 : i1 to i32
    %c0_i32_12 = arith.constant 0 : i32
    %15 = arith.cmpi ne, %14, %c0_i32_12 : i32
    scf.if %15 {
      %cst_19 = arith.constant 0.000000e+00 : f32
      %20 = vector.broadcast %cst_19 : f32 to vector<1x16x128xf32>
      %c0_20 = arith.constant 0 : index
      %c0_21 = arith.constant 0 : index
      %c0_22 = arith.constant 0 : index
      %21 = vector.load %arg6[%c0_20, %c0_21, %c0_22] : memref<1x16x128xf32, #tpu.memory_space<vmem>>, vector<1x16x128xf32>
      tpu.vector_store %arg6[%c0_20, %c0_21, %c0_22], %20 {strides = array<i32>} : memref<1x16x128xf32, #tpu.memory_space<vmem>>, vector<1x16x128xf32>,
    } else {
    }
    %c0_13 = arith.constant 0 : index
    %c0_14 = arith.constant 0 : index
    %c0_15 = arith.constant 0 : index
    %16 = vector.load %arg6[%c0_13, %c0_14, %c0_15] : memref<1x16x128xf32, #tpu.memory_space<vmem>>, vector<1x16x128xf32>
    %17 = vector.shape_cast %12 : vector<16x128xf32> to vector<1x16x128xf32>
    %18 = arith.addf %16, %17 : vector<1x16x128xf32>
    %c0_16 = arith.constant 0 : index
    %c0_17 = arith.constant 0 : index
    %c0_18 = arith.constant 0 : index
    %19 = vector.load %arg6[%c0_16, %c0_17, %c0_18] : memref<1x16x128xf32, #tpu.memory_space<vmem>>, vector<1x16x128xf32>
    tpu.vector_store %arg6[%c0_16, %c0_17, %c0_18], %18 {strides = array<i32>} : memref<1x16x128xf32, #tpu.memory_space<vmem>>, vector<1x16x128xf32>,
    return
  }
  func.func @transform_0(%arg0: i32, %arg1: i32) -> (i32, i32, i32) {
    %c0_i32 = arith.constant 0 : i32
    %c0_i32_0 = arith.constant 0 : i32
    return %arg0, %arg1, %c0_i32 : i32, i32, i32
  }
  func.func @transform_1(%arg0: i32, %arg1: i32) -> (i32, i32, i32) {
    %c0_i32 = arith.constant 0 : i32
    %c0_i32_0 = arith.constant 0 : i32
    %c0_i32_1 = arith.constant 0 : i32
    return %arg0, %c0_i32, %c0_i32_0 : i32, i32, i32
  }
  func.func @transform_2(%arg0: i32, %arg1: i32) -> (i32, i32, i32) {
    %c0_i32 = arith.constant 0 : i32
    %c0_i32_0 = arith.constant 0 : i32
    %c0_i32_1 = arith.constant 0 : i32
    return %arg0, %c0_i32, %c0_i32_0 : i32, i32, i32
  }
  func.func @transform_3(%arg0: i32, %arg1: i32) -> (i32, i32) {
    %c0_i32 = arith.constant 0 : i32
    %c0_i32_0 = arith.constant 0 : i32
    return %c0_i32, %arg1 : i32, i32
  }
  func.func @transform_4(%arg0: i32, %arg1: i32) -> (i32, i32, i32) {
    %c0_i32 = arith.constant 0 : i32
    %c0_i32_0 = arith.constant 0 : i32
    %c0_i32_1 = arith.constant 0 : i32
    return %arg0, %c0_i32, %c0_i32_0 : i32, i32, i32
  }
}

module attributes {stable_mosaic.version = 11 : i64} {
  func.func @_head_ensemble_kernel(%arg0: i32, %arg1: memref<2x16x128xf32, #tpu.memory_space<vmem>>, %arg2: memref<2x128x128xbf16, #tpu.memory_space<vmem>>, %arg3: memref<2x1x128xf32, #tpu.memory_space<vmem>>, %arg4: memref<2x128x128xbf16, #tpu.memory_space<vmem>>, %arg5: memref<2x1x128xf32, #tpu.memory_space<vmem>>, %arg6: memref<2x128xf32, #tpu.memory_space<vmem>>, %arg7: memref<8x128xf32, #tpu.memory_space<vmem>>) attributes {dimension_semantics = [#tpu.dimension_semantics<arbitrary>], iteration_bounds = array<i64: 1>, scalar_prefetch = 0 : i64, scratch_operands = 0 : i64, tpu.core_type = #tpu.core_type<tc>, window_params = [{pipeline_mode = #tpu.pipeline_mode<synchronous>, transform_indices = @transform_0, window_bounds = array<i64: 2, 16, 128>}, {pipeline_mode = #tpu.pipeline_mode<synchronous>, transform_indices = @transform_1, window_bounds = array<i64: 2, 128, 128>}, {pipeline_mode = #tpu.pipeline_mode<synchronous>, transform_indices = @transform_2, window_bounds = array<i64: 2, 1, 128>}, {pipeline_mode = #tpu.pipeline_mode<synchronous>, transform_indices = @transform_3, window_bounds = array<i64: 2, 128, 128>}, {pipeline_mode = #tpu.pipeline_mode<synchronous>, transform_indices = @transform_4, window_bounds = array<i64: 2, 1, 128>}, {pipeline_mode = #tpu.pipeline_mode<synchronous>, transform_indices = @transform_5, window_bounds = array<i64: 2, 128>}, {pipeline_mode = #tpu.pipeline_mode<synchronous>, transform_indices = @transform_6, window_bounds = array<i64: 8, 128>}]} {
    %c0 = arith.constant 0 : index
    %c0_0 = arith.constant 0 : index
    %c0_1 = arith.constant 0 : index
    %0 = vector.load %arg1[%c0, %c0_0, %c0_1] : memref<2x16x128xf32, #tpu.memory_space<vmem>>, vector<2x16x128xf32>
    %1 = arith.truncf %0 : vector<2x16x128xf32> to vector<2x16x128xbf16>
    %2 = vector.extract_strided_slice %1 {offsets = [0, 0, 0], sizes = [1, 16, 128], strides = [1, 1, 1]} : vector<2x16x128xbf16> to vector<1x16x128xbf16>
    %3 = vector.shape_cast %2 : vector<1x16x128xbf16> to vector<16x128xbf16>
    %c0_2 = arith.constant 0 : index
    %c0_3 = arith.constant 0 : index
    %c0_4 = arith.constant 0 : index
    %4 = vector.load %arg2[%c0_2, %c0_3, %c0_4] : memref<2x128x128xbf16, #tpu.memory_space<vmem>>, vector<1x128x128xbf16>
    %5 = vector.shape_cast %4 : vector<1x128x128xbf16> to vector<128x128xbf16>
    %cst = arith.constant dense<0.000000e+00> : vector<16x128xf32>
    %6 = tpu.matmul %3, %5, %cst {dimension_numbers = #tpu.dot_dimension_numbers<[1], [0], [0], [1], [0, 0, 1, 1], [], []>} : vector<16x128xbf16>, vector<128x128xbf16>, vector<16x128xf32> -> vector<16x128xf32>
    %c0_5 = arith.constant 0 : index
    %c0_6 = arith.constant 0 : index
    %c0_7 = arith.constant 0 : index
    %7 = vector.load %arg3[%c0_5, %c0_6, %c0_7] : memref<2x1x128xf32, #tpu.memory_space<vmem>>, vector<1x1x128xf32>
    %8 = vector.shape_cast %7 : vector<1x1x128xf32> to vector<1x128xf32>
    %9 = vector.broadcast %8 : vector<1x128xf32> to vector<16x128xf32>
    %10 = arith.addf %6, %9 : vector<16x128xf32>
    %c0_8 = arith.constant 0 : index
    %c0_9 = arith.constant 0 : index
    %c0_10 = arith.constant 0 : index
    %11 = vector.load %arg4[%c0_8, %c0_9, %c0_10] : memref<2x128x128xbf16, #tpu.memory_space<vmem>>, vector<1x128x128xbf16>
    %12 = vector.shape_cast %11 : vector<1x128x128xbf16> to vector<128x128xbf16>
    %cst_11 = arith.constant dense<0.000000e+00> : vector<16x128xf32>
    %13 = tpu.matmul %3, %12, %cst_11 {dimension_numbers = #tpu.dot_dimension_numbers<[1], [0], [0], [1], [0, 0, 1, 1], [], []>} : vector<16x128xbf16>, vector<128x128xbf16>, vector<16x128xf32> -> vector<16x128xf32>
    %c0_12 = arith.constant 0 : index
    %c0_13 = arith.constant 0 : index
    %c0_14 = arith.constant 0 : index
    %14 = vector.load %arg5[%c0_12, %c0_13, %c0_14] : memref<2x1x128xf32, #tpu.memory_space<vmem>>, vector<1x1x128xf32>
    %15 = vector.shape_cast %14 : vector<1x1x128xf32> to vector<1x128xf32>
    %16 = vector.broadcast %15 : vector<1x128xf32> to vector<16x128xf32>
    %17 = arith.addf %13, %16 : vector<16x128xf32>
    %18 = vector.extract_strided_slice %1 {offsets = [1, 0, 0], sizes = [1, 16, 128], strides = [1, 1, 1]} : vector<2x16x128xbf16> to vector<1x16x128xbf16>
    %19 = vector.shape_cast %18 : vector<1x16x128xbf16> to vector<16x128xbf16>
    %c1 = arith.constant 1 : index
    %c0_15 = arith.constant 0 : index
    %c0_16 = arith.constant 0 : index
    %20 = vector.load %arg2[%c1, %c0_15, %c0_16] : memref<2x128x128xbf16, #tpu.memory_space<vmem>>, vector<1x128x128xbf16>
    %21 = vector.shape_cast %20 : vector<1x128x128xbf16> to vector<128x128xbf16>
    %cst_17 = arith.constant dense<0.000000e+00> : vector<16x128xf32>
    %22 = tpu.matmul %19, %21, %cst_17 {dimension_numbers = #tpu.dot_dimension_numbers<[1], [0], [0], [1], [0, 0, 1, 1], [], []>} : vector<16x128xbf16>, vector<128x128xbf16>, vector<16x128xf32> -> vector<16x128xf32>
    %c1_18 = arith.constant 1 : index
    %c0_19 = arith.constant 0 : index
    %c0_20 = arith.constant 0 : index
    %23 = vector.load %arg3[%c1_18, %c0_19, %c0_20] : memref<2x1x128xf32, #tpu.memory_space<vmem>>, vector<1x1x128xf32>
    %24 = vector.shape_cast %23 : vector<1x1x128xf32> to vector<1x128xf32>
    %25 = vector.broadcast %24 : vector<1x128xf32> to vector<16x128xf32>
    %26 = arith.addf %22, %25 : vector<16x128xf32>
    %c1_21 = arith.constant 1 : index
    %c0_22 = arith.constant 0 : index
    %c0_23 = arith.constant 0 : index
    %27 = vector.load %arg4[%c1_21, %c0_22, %c0_23] : memref<2x128x128xbf16, #tpu.memory_space<vmem>>, vector<1x128x128xbf16>
    %28 = vector.shape_cast %27 : vector<1x128x128xbf16> to vector<128x128xbf16>
    %cst_24 = arith.constant dense<0.000000e+00> : vector<16x128xf32>
    %29 = tpu.matmul %19, %28, %cst_24 {dimension_numbers = #tpu.dot_dimension_numbers<[1], [0], [0], [1], [0, 0, 1, 1], [], []>} : vector<16x128xbf16>, vector<128x128xbf16>, vector<16x128xf32> -> vector<16x128xf32>
    %c1_25 = arith.constant 1 : index
    %c0_26 = arith.constant 0 : index
    %c0_27 = arith.constant 0 : index
    %30 = vector.load %arg5[%c1_25, %c0_26, %c0_27] : memref<2x1x128xf32, #tpu.memory_space<vmem>>, vector<1x1x128xf32>
    %31 = vector.shape_cast %30 : vector<1x1x128xf32> to vector<1x128xf32>
    %32 = vector.broadcast %31 : vector<1x128xf32> to vector<16x128xf32>
    %33 = arith.addf %29, %32 : vector<16x128xf32>
    %34 = vector.extract_strided_slice %10 {offsets = [0, 0], sizes = [2, 128], strides = [1, 1]} : vector<16x128xf32> to vector<2x128xf32>
    %35 = vector.extract_strided_slice %26 {offsets = [0, 0], sizes = [2, 128], strides = [1, 1]} : vector<16x128xf32> to vector<2x128xf32>
    %36 = arith.addf %34, %35 : vector<2x128xf32>
    %cst_28 = arith.constant 5.000000e-01 : f32
    %37 = vector.broadcast %cst_28 : f32 to vector<2x128xf32>
    %38 = arith.mulf %37, %36 : vector<2x128xf32>
    %c0_29 = arith.constant 0 : index
    %c0_30 = arith.constant 0 : index
    %39 = vector.load %arg6[%c0_29, %c0_30] : memref<2x128xf32, #tpu.memory_space<vmem>>, vector<2x128xf32>
    tpu.vector_store %arg6[%c0_29, %c0_30], %38 {strides = array<i32>} : memref<2x128xf32, #tpu.memory_space<vmem>>, vector<2x128xf32>,
    %40 = vector.extract_strided_slice %17 {offsets = [8, 0], sizes = [8, 128], strides = [1, 1]} : vector<16x128xf32> to vector<8x128xf32>
    %41 = vector.extract_strided_slice %33 {offsets = [8, 0], sizes = [8, 128], strides = [1, 1]} : vector<16x128xf32> to vector<8x128xf32>
    %42 = arith.addf %40, %41 : vector<8x128xf32>
    %cst_31 = arith.constant 5.000000e-01 : f32
    %43 = vector.broadcast %cst_31 : f32 to vector<8x128xf32>
    %44 = arith.mulf %43, %42 : vector<8x128xf32>
    %c0_32 = arith.constant 0 : index
    %c0_33 = arith.constant 0 : index
    %45 = vector.load %arg7[%c0_32, %c0_33] : memref<8x128xf32, #tpu.memory_space<vmem>>, vector<8x128xf32>
    tpu.vector_store %arg7[%c0_32, %c0_33], %44 {strides = array<i32>} : memref<8x128xf32, #tpu.memory_space<vmem>>, vector<8x128xf32>,
    return
  }
  func.func @transform_0(%arg0: i32) -> (i32, i32, i32) {
    %c0_i32 = arith.constant 0 : i32
    %c0_i32_0 = arith.constant 0 : i32
    %c0_i32_1 = arith.constant 0 : i32
    %c0_i32_2 = arith.constant 0 : i32
    return %c0_i32, %c0_i32_0, %c0_i32_1 : i32, i32, i32
  }
  func.func @transform_1(%arg0: i32) -> (i32, i32, i32) {
    %c0_i32 = arith.constant 0 : i32
    %c0_i32_0 = arith.constant 0 : i32
    %c0_i32_1 = arith.constant 0 : i32
    %c0_i32_2 = arith.constant 0 : i32
    return %c0_i32, %c0_i32_0, %c0_i32_1 : i32, i32, i32
  }
  func.func @transform_2(%arg0: i32) -> (i32, i32, i32) {
    %c0_i32 = arith.constant 0 : i32
    %c0_i32_0 = arith.constant 0 : i32
    %c0_i32_1 = arith.constant 0 : i32
    %c0_i32_2 = arith.constant 0 : i32
    return %c0_i32, %c0_i32_0, %c0_i32_1 : i32, i32, i32
  }
  func.func @transform_3(%arg0: i32) -> (i32, i32, i32) {
    %c0_i32 = arith.constant 0 : i32
    %c0_i32_0 = arith.constant 0 : i32
    %c0_i32_1 = arith.constant 0 : i32
    %c0_i32_2 = arith.constant 0 : i32
    return %c0_i32, %c0_i32_0, %c0_i32_1 : i32, i32, i32
  }
  func.func @transform_4(%arg0: i32) -> (i32, i32, i32) {
    %c0_i32 = arith.constant 0 : i32
    %c0_i32_0 = arith.constant 0 : i32
    %c0_i32_1 = arith.constant 0 : i32
    %c0_i32_2 = arith.constant 0 : i32
    return %c0_i32, %c0_i32_0, %c0_i32_1 : i32, i32, i32
  }
  func.func @transform_5(%arg0: i32) -> (i32, i32) {
    %c0_i32 = arith.constant 0 : i32
    %c0_i32_0 = arith.constant 0 : i32
    %c0_i32_1 = arith.constant 0 : i32
    return %c0_i32, %c0_i32_0 : i32, i32
  }
  func.func @transform_6(%arg0: i32) -> (i32, i32) {
    %c0_i32 = arith.constant 0 : i32
    %c0_i32_0 = arith.constant 0 : i32
    %c0_i32_1 = arith.constant 0 : i32
    return %c0_i32, %c0_i32_0 : i32, i32
  }
}

</mosaic_0001>

<bundles_post_ra>
// kernel: ensemble_forward.2
= control target key start
LH: loop header
LB: loop body
LE: loop exit
PB: predicated region body
PF: predicated region fallthrough
CT: control target
= control target key end

     0   :  { %s1254_s15 = smov 0   ;;  %s1256_s16 = smov 0   ;;  %s1446_s0 = inlined_call_operand.vmem [shape: bf16[2,512,128], index: 0, kind: input, shape index: {}]   ;;  %s1447_s1 = inlined_call_operand.vmem [shape: bf16[2,128,128], index: 1, kind: input, shape index: {}]   ;;  %s1448_s2 = inlined_call_operand.vmem [shape: f32[2,1,128], index: 2, kind: input, shape index: {}]   ;;  %s1449_s3 = inlined_call_operand.vmem [shape: f32[16,512], index: 3, kind: input, shape index: {}]   ;;  %s1450_s4 = inlined_call_operand.vmem [shape: f32[2,16,128], index: 4, kind: output, shape index: {}]  }
   0x1   :  { %s1258_s17 = smov 0   ;;  %s1260_s18 = smov 0  }
   0x2   :  { %s1262_s19 = smov 0   ;;  %s1264_s20 = smov 0  }
   0x3   :  { %s1266_s21 = smov 0  }
   0x4 LB: > { %s23_s22 = sadd.s32 1, %s1218_s19  ;;  %s26_s23 = sadd.s32 1, %s1222_s20  ;;  %s1226_s21 = sphi %s1266_s21, %s14_s21   ;;  %s1222_s20 = sphi %s1264_s20, %s1456_s20   ;;  %s1218_s19 = sphi %s1262_s19, %s1455_s19   ;;  %s1214_s18 = sphi %s1260_s18, %s1454_s18   ;;  %s1210_s17 = sphi %s1258_s17, %s1453_s17   ;;  %s1206_s16 = sphi %s1256_s16, %s1452_s16   ;;  %s1202_s15 = sphi %s1254_s15, %s1451_s15  }
   0x5   : > { %p24_p0 = scmp.ge.s32.totalorder %s23_s22, 2  ;;  %s113_s24 = sadd.s32 1, %s1206_s16 }
   0x6   : > { %p120_p1 = scmp.ne.s32.totalorder %s1206_s16, %s1202_s15  ;;  %p121_p2 = scmp.eq.s32.totalorder %s1226_s21, 0 }
   0x7   : > { %s1458_s22 = smov (%p24_p0, %s23_s22), 0  ;;  %s1460_s23 = smov (!%p24_p0, %s26_s23), %s1222_s20 }
   0x8   : > { %s110_s25 = ssub.s32 %s1218_s19, %s1458_s22  ;;  %p122_p3 = por %p121_p2, %p120_p1 }
   0x9   : > { %p28_p4 = scmp.ge.s32.totalorder %s1460_s23, 2  ;;  %p111_p5 = scmp.eq.s32.totalorder %s110_s25, 0 }
   0xa   : > { %p905_p6 = scmp.ge.s32.totalorder %s1226_s21, 4 }
   0xb   : > { %s1462_s23 = smov (%p28_p4, %s1460_s23), 0 }
   0xc   : > { %s1303_s26 = scalar_select %p111_p5, %s1206_s16, %s113_s24  }
   0xd   : > { %172 = sbr.rel (%p905_p6) target bundleno = 27 (0x1b), region = 16 }
  0x14   : > { %202 = sbr.rel (!%p122_p3) target bundleno = 27 (0x1b), region = 32  ;;  %s204_s27 = sand.u32 (%p122_p3), 1, %s1206_s16  }
  0x15   : > { %s946_s28 = sshll.u32 (%p122_p3), %s1218_s19, 4  ;;  %s906_s29 = sshll.u32 (%p122_p3), %s204_s27, 5 }
  0x16   : > { %s209_s6 = scalar_lea.vmem (%p122_p3), %s1449_s3, %s946_s28  ;;  %s206_s7 = scalar_lea.vmem (%p122_p3), [#allocation2], %s906_s29 }
  0x17   : > { %v222_v0 = vld [vmem:[%s209_s6] sm:$0xff] (%p122_p3)  ;;  %v224_v1 = vld [vmem:[%s209_s6 + $0x8] sm:$0xff] (%p122_p3) }
  0x18   : > { %v226_v2 = vld [vmem:[%s209_s6 + $0x20] sm:$0xff] (%p122_p3)  ;;  %223 = vst [vmem:[%s206_s7] sm:$0xff] (%p122_p3), %v222_v0  ;;  %225 = vst [vmem:[%s206_s7 + $0x8] sm:$0xff] (%p122_p3), %v224_v1  ;;  %v228_v3 = vld [vmem:[%s209_s6 + $0x28] sm:$0xff] (%p122_p3) }
  0x19   : > { %227 = vst [vmem:[%s206_s7 + $0x10] sm:$0xff] (%p122_p3), %v226_v2  ;;  %229 = vst [vmem:[%s206_s7 + $0x18] sm:$0xff] (%p122_p3), %v228_v3 }
  0x1b PF: > { %p909_p7 = scmp.ge.s32.totalorder %s1226_s21, 1  ;;  %p234_p8 = scmp.lt.s32.totalorder %s1226_s21, 5 }
  0x1d   : > { %p235_p9 = pnand %p909_p7, %p234_p8 }
  0x1e   : > { %s911_s8 = sshll.u32 (!%p235_p9), %s1210_s17, 5  ;;  %p284_p10 = scmp.lt.s32.totalorder (!%p235_p9), %s1214_s18, 1 }
  0x1f   : > { %238 = sbr.rel (%p235_p9) target bundleno = 581 (0x245), region = 55  ;;  %p286_p11 = scmp.lt.s32.totalorder (!%p235_p9), %s911_s8, 63 }
  0x20   : > { %s241_s6 = sand.u32 (!%p235_p9), 1, %s1202_s15   ;;  %p943_p12 = scmp.ne.s32.totalorder (!%p235_p9), %s1210_s17, 0 }
  0x21   : > { %s910_s7 = sshll.u32 (!%p235_p9), %s241_s6, 5 }
  0x26   : > { %s1464_s18 = smov (!%p284_p10, %s1214_s18), 1  ;;  %s1466_s8 = smov (!%p286_p11, %s911_s8), 63 }
  0x27   : > { %s912_s9 = sshll.u32 %s1464_s18, 6  ;;  %s948_s14 = sshll.u32 %s1464_s18, 4 }
  0x28   : > { %s297_s12 = scalar_lea.vmem %s1447_s1, %s912_s9  ;;  %s289_s13 = sadd.s32 %s912_s9, %s1466_s8 }
  0x29   : > { %s1326_s27 = scalar_lea.vmem %s1450_s4, %s948_s14  ;;  %v1148_v4 = vld [vmem:[%s297_s12] sm:$0xff]   ;;  %v1149_v5 = vld [vmem:[%s297_s12 + $0x8] sm:$0xff]   ;;  %s913_s28 = sshll.u32 %s289_s13, 2  ;;  %v1150_v6 = vld [vmem:[%s297_s12 + $0x10] sm:$0xff]  }
  0x2a   : > { %1011 = vmatprep.subr.bf16.mxu0 %v1148_v4  ;;  %s1331_s5 = scalar_lea.vmem %s1446_s0, %s913_s28  ;;  %v1151_v7 = vld [vmem:[%s297_s12 + $0x18] sm:$0xff]   ;;  %v1152_v9 = vld [vmem:[%s297_s12 + $0x20] sm:$0xff]   ;;  %v1153_v10 = vld [vmem:[%s297_s12 + $0x28] sm:$0xff]   ;;  %s1350_s8 = scalar_lea.vmem [#allocation2], %s910_s7 }
  0x2b   : > { %1012 = vmatpush3.bf16.msra.mxu0 %v1148_v4  ;;  %v1156_v8 = vld [vmem:[%s1331_s5] sm:$0xff]   ;;  %v1154_v11 = vld [vmem:[%s297_s12 + $0x30] sm:$0xff]   ;;  %v1155_v12 = vld [vmem:[%s297_s12 + $0x38] sm:$0xff]   ;;  %s300_s11 = scalar_lea.vmem %s1448_s2, %s1464_s18 }
  0x2c   : > { %1013 = vmatprep.subr.bf16.mxu0 %v1149_v5  ;;  %1027 = vmatprep.mubr.bf16.mxu0 %v1156_v8  ;;  %v1157_v13 = vld [vmem:[%s1331_s5 + $0x8] sm:$0xff]   ;;  %v1158_v14 = vld [vmem:[%s1331_s5 + $0x10] sm:$0xff]   ;;  %v1159_v15 = vld [vmem:[%s1331_s5 + $0x18] sm:$0xff]  }
  0x2d   : > { %v1160_v16 = vld [vmem:[%s1331_s5 + $0x20] sm:$0xff]   ;;  %v1161_v17 = vld [vmem:[%s1331_s5 + $0x28] sm:$0xff]   ;;  %v1162_v18 = vld [vmem:[%s1331_s5 + $0x30] sm:$0xff]  }
  0x2e   : > { %v1163_v19 = vld [vmem:[%s1331_s5 + $0x38] sm:$0xff]   ;;  %v1164_v20 = vld [vmem:[%s1331_s5 + $0x40] sm:$0xff]   ;;  %v1165_v21 = vld [vmem:[%s1331_s5 + $0x48] sm:$0xff]  }
  0x2f   : > { %1014 = vmatpush3.bf16.msra.mxu0 %v1149_v5  ;;  %v1166_v22 = vld [vmem:[%s1331_s5 + $0x50] sm:$0xff]   ;;  %v1167_v23 = vld [vmem:[%s1331_s5 + $0x58] sm:$0xff]   ;;  %v1168_v24 = vld [vmem:[%s1331_s5 + $0x60] sm:$0xff]  }
  0x30   : > { %1015 = vmatprep.subr.bf16.mxu0 %v1150_v6  ;;  %v1169_v25 = vld [vmem:[%s1331_s5 + $0x68] sm:$0xff]   ;;  %v1170_v26 = vld [vmem:[%s1331_s5 + $0x70] sm:$0xff]   ;;  %v1171_v27 = vld [vmem:[%s1331_s5 + $0x78] sm:$0xff]  }
  0x31   : > { %v701_v28 = vld [vmem:[%s1350_s8 + $0x8] sm:$0xff]  ;;  %v1357_v29 = vld [vmem:[%s300_s11] ss:$0 sm:$0xff] }
  0x32   : > { %768 = vmatprep.mubr.f32.mxu1 %v701_v28 }
  0x33   : > { %1016 = vmatpush3.bf16.msra.mxu0 %v1150_v6 }
  0x34   : > { %1017 = vmatprep.subr.bf16.mxu0 %v1151_v7 }
  0x37   : > { %1018 = vmatpush3.bf16.msra.mxu0 %v1151_v7 }
  0x38   : > { %1019 = vmatprep.subr.bf16.mxu0 %v1152_v9 }
  0x3b   : > { %1020 = vmatpush3.bf16.msra.mxu0 %v1152_v9 }
  0x3c   : > { %1021 = vmatprep.subr.bf16.mxu0 %v1153_v10 }
  0x3f   : > { %1022 = vmatpush3.bf16.msra.mxu0 %v1153_v10 }
  0x40   : > { %1023 = vmatprep.subr.bf16.mxu0 %v1154_v11 }
  0x43   : > { %1024 = vmatpush3.bf16.msra.mxu0 %v1154_v11 }
  0x44   : > { %1025 = vmatprep.subr.bf16.mxu0 %v1155_v12 }
  0x47   : > { %1026 = vmatpush3.bf16.msra.mxu0 %v1155_v12 }
  0x4a   : > { %1028 = vmatmul.mubr.bf16.vlgmr.msra.gmra.mrb[0].mxu0 %v1157_v13 }
  0x4b   : > { %1031 = vmatprep.mubr.bf16.mxu0 %v1158_v14 }
  0x52   : > { %1032 = vmatmul.mubr.bf16.gmra.mrb[4].mxu0 %v1159_v15 }
  0x53   : > { %1035 = vmatprep.mubr.bf16.mxu0 %v1160_v16 }
  0x5a   : > { %1036 = vmatmul.mubr.bf16.gmra.mrb[8].mxu0 %v1161_v17 }
  0x5b   : > { %1039 = vmatprep.mubr.bf16.mxu0 %v1162_v18 }
  0x62   : > { %1040 = vmatmul.mubr.bf16.gmra.mrb[12].mxu0 %v1163_v19 }
  0x63   : > { %1043 = vmatprep.mubr.bf16.mxu0 %v1164_v20 }
  0x6a   : > { %1044 = vmatmul.mubr.bf16.gmra.mrb[16].mxu0 %v1165_v21 }
  0x6b   : > { %1047 = vmatprep.mubr.bf16.mxu0 %v1166_v22 }
  0x72   : > { %1048 = vmatmul.mubr.bf16.gmra.mrb[20].mxu0 %v1167_v23 }
  0x73   : > { %1051 = vmatprep.mubr.bf16.mxu0 %v1168_v24 }
  0x7a   : > { %1052 = vmatmul.mubr.bf16.gmra.mrb[24].mxu0 %v1169_v25 }
  0x7b   : > { %1055 = vmatprep.mubr.bf16.mxu0 %v1170_v26 }
  0x82   : > { %1056 = vmatmul.mubr.bf16.gmra.mrb[28].mxu0 %v1171_v27 }
 0x11d   : > { %v1029_v30 = vpop.f32.mrb[0].mxu0 }
 0x11e   : > { %v550_v31 = vadd.f32 %v1029_v30, %v1357_v29  ;;  %v541_v32 = vpop.f32.mrb[1].mxu0 }
 0x11f   : > { %v542_v33 = vadd.f32 %v1357_v29, %v541_v32  ;;  %v1030_v34 = vpop.f32.mrb[2].mxu0 }
 0x120   : > { %v553_v35 = vadd.f32 %v1030_v34, %v1357_v29  ;;  %v544_v36 = vpop.f32.mrb[3].mxu0  ;;  %v670_v38 = vmax.f32 %v550_v31, 0.0 }
 0x121   : > { %v545_v37 = vadd.f32 %v1357_v29, %v544_v36  ;;  %v668_v40 = vmax.f32 %v542_v33, 0.0 }
 0x122   : > { %v671_v39 = vmax.f32 %v553_v35, 0.0 }
 0x123   : > { %v669_v41 = vmax.f32 %v545_v37, 0.0 }
 0x124   : > { %v1363_v42 = vpack.c.bf16 %v671_v39, %v670_v38 }
 0x125   : > { %v1033_v43 = vpop.f32.mrb[4].mxu0  ;;  %v1365_v44 = vpack.c.bf16 %v669_v41, %v668_v40 }
 0x126   : > { %v566_v45 = vadd.f32 %v1033_v43, %v1357_v29  ;;  %v557_v46 = vpop.f32.mrb[5].mxu0 }
 0x127   : > { %v558_v47 = vadd.f32 %v1357_v29, %v557_v46  ;;  %v1034_v48 = vpop.f32.mrb[6].mxu0 }
 0x128   : > { %v569_v49 = vadd.f32 %v1034_v48, %v1357_v29  ;;  %v560_v50 = vpop.f32.mrb[7].mxu0  ;;  %v674_v52 = vmax.f32 %v566_v45, 0.0 }
 0x129   : > { %v561_v51 = vadd.f32 %v1357_v29, %v560_v50  ;;  %v672_v54 = vmax.f32 %v558_v47, 0.0 }
 0x12a   : > { %v675_v53 = vmax.f32 %v569_v49, 0.0 }
 0x12b   : > { %v673_v55 = vmax.f32 %v561_v51, 0.0 }
 0x12c   : > { %v1371_v56 = vpack.c.bf16 %v675_v53, %v674_v52 }
 0x12d   : > { %v1373_v57 = vpack.c.bf16 %v673_v55, %v672_v54  ;;  %v1037_v58 = vpop.f32.mrb[8].mxu0 }
 0x12e   : > { %v582_v59 = vadd.f32 %v1037_v58, %v1357_v29  ;;  %v573_v60 = vpop.f32.mrb[9].mxu0 }
 0x12f   : > { %v574_v61 = vadd.f32 %v1357_v29, %v573_v60  ;;  %v1038_v62 = vpop.f32.mrb[10].mxu0 }
 0x130   : > { %v585_v63 = vadd.f32 %v1038_v62, %v1357_v29  ;;  %v576_v0 = vpop.f32.mrb[11].mxu0  ;;  %v678_v2 = vmax.f32 %v582_v59, 0.0 }
 0x131   : > { %v577_v1 = vadd.f32 %v1357_v29, %v576_v0  ;;  %v676_v4 = vmax.f32 %v574_v61, 0.0 }
 0x132   : > { %v679_v3 = vmax.f32 %v585_v63, 0.0 }
 0x133   : > { %v677_v5 = vmax.f32 %v577_v1, 0.0 }
 0x134   : > { %v1379_v6 = vpack.c.bf16 %v679_v3, %v678_v2 }
 0x135   : > { %v1381_v7 = vpack.c.bf16 %v677_v5, %v676_v4  ;;  %v1041_v8 = vpop.f32.mrb[12].mxu0 }
 0x136   : > { %v598_v9 = vadd.f32 %v1041_v8, %v1357_v29  ;;  %v589_v10 = vpop.f32.mrb[13].mxu0 }
 0x137   : > { %v590_v11 = vadd.f32 %v1357_v29, %v589_v10  ;;  %v1042_v12 = vpop.f32.mrb[14].mxu0 }
 0x138   : > { %v601_v13 = vadd.f32 %v1042_v12, %v1357_v29  ;;  %v592_v14 = vpop.f32.mrb[15].mxu0  ;;  %v682_v16 = vmax.f32 %v598_v9, 0.0 }
 0x139   : > { %v593_v15 = vadd.f32 %v1357_v29, %v592_v14  ;;  %v680_v18 = vmax.f32 %v590_v11, 0.0 }
 0x13a   : > { %v683_v17 = vmax.f32 %v601_v13, 0.0 }
 0x13b   : > { %v681_v19 = vmax.f32 %v593_v15, 0.0 }
 0x13c   : > { %v1387_v20 = vpack.c.bf16 %v683_v17, %v682_v16  ;;  %v700_v17 = vld [vmem:[%s1350_s8] sm:$0xff] }
 0x13d   : > { %v1389_v21 = vpack.c.bf16 %v681_v19, %v680_v18  ;;  %v1045_v22 = vpop.f32.mrb[16].mxu0 }
 0x13e   : > { %v614_v23 = vadd.f32 %v1045_v22, %v1357_v29  ;;  %v605_v24 = vpop.f32.mrb[17].mxu0 }
 0x13f   : > { %v606_v25 = vadd.f32 %v1357_v29, %v605_v24  ;;  %v1046_v26 = vpop.f32.mrb[18].mxu0 }
 0x140   : > { %v617_v27 = vadd.f32 %v1046_v26, %v1357_v29  ;;  %v608_v28 = vpop.f32.mrb[19].mxu0  ;;  %v686_v31 = vmax.f32 %v614_v23, 0.0 }
 0x141   : > { %v609_v30 = vadd.f32 %v1357_v29, %v608_v28  ;;  %v684_v33 = vmax.f32 %v606_v25, 0.0 }
 0x142   : > { %v687_v32 = vmax.f32 %v617_v27, 0.0 }
 0x143   : > { %v685_v34 = vmax.f32 %v609_v30, 0.0 }
 0x144   : > { %v1063_v35 = vpack.c.bf16 %v687_v32, %v686_v31 }
 0x145   : > { %v1049_v36 = vpop.f32.mrb[20].mxu0  ;;  %v1059_v37 = vpack.c.bf16 %v685_v34, %v684_v33 }
 0x146   : > { %v630_v38 = vadd.f32 %v1049_v36, %v1357_v29  ;;  %v621_v39 = vpop.f32.mrb[21].mxu0 }
 0x147   : > { %v622_v40 = vadd.f32 %v1357_v29, %v621_v39  ;;  %v1050_v41 = vpop.f32.mrb[22].mxu0  ;;  %1060 = vmatprep.subr.bf16.mxu1 %v1059_v37 }
 0x148   : > { %v633_v43 = vadd.f32 %v1050_v41, %v1357_v29  ;;  %v624_v45 = vpop.f32.mrb[23].mxu0  ;;  %1062 = vmatpush3.bf16.msra.mxu1 %v1365_v44  ;;  %v690_v47 = vmax.f32 %v630_v38, 0.0 }
 0x149   : > { %v625_v46 = vadd.f32 %v1357_v29, %v624_v45  ;;  %1064 = vmatprep.subr.bf16.mxu1 %v1063_v35  ;;  %v688_v49 = vmax.f32 %v622_v40, 0.0 }
 0x14a   : > { %v691_v48 = vmax.f32 %v633_v43, 0.0 }
 0x14b   : > { %v689_v50 = vmax.f32 %v625_v46, 0.0 }
 0x14c   : > { %v1071_v51 = vpack.c.bf16 %v691_v48, %v690_v47  ;;  %1066 = vmatpush3.bf16.msra.mxu1 %v1363_v42 }
 0x14d   : > { %v1067_v52 = vpack.c.bf16 %v689_v50, %v688_v49  ;;  %v1053_v53 = vpop.f32.mrb[24].mxu0 }
 0x14e   : > { %v646_v54 = vadd.f32 %v1053_v53, %v1357_v29  ;;  %v637_v55 = vpop.f32.mrb[25].mxu0 }
 0x14f   : > { %v638_v58 = vadd.f32 %v1357_v29, %v637_v55  ;;  %v1054_v59 = vpop.f32.mrb[26].mxu0  ;;  %1068 = vmatprep.subr.bf16.mxu1 %v1067_v52 }
 0x150   : > { %v649_v44 = vadd.f32 %v1054_v59, %v1357_v29  ;;  %v640_v60 = vpop.f32.mrb[27].mxu0  ;;  %1070 = vmatpush3.bf16.msra.mxu1 %v1373_v57  ;;  %v694_v62 = vmax.f32 %v646_v54, 0.0 }
 0x151   : > { %v641_v61 = vadd.f32 %v1357_v29, %v640_v60  ;;  %1072 = vmatprep.subr.bf16.mxu1 %v1071_v51  ;;  %v692_v42 = vmax.f32 %v638_v58, 0.0 }
 0x152   : > { %v695_v63 = vmax.f32 %v649_v44, 0.0 }
 0x153   : > { %v693_v0 = vmax.f32 %v641_v61, 0.0 }
 0x154   : > { %v1079_v1 = vpack.c.bf16 %v695_v63, %v694_v62  ;;  %1074 = vmatpush3.bf16.msra.mxu1 %v1371_v56 }
 0x155   : > { %v1075_v2 = vpack.c.bf16 %v693_v0, %v692_v42  ;;  %v1057_v3 = vpop.f32.mrb[28].mxu0 }
 0x156   : > { %v662_v4 = vadd.f32 %v1057_v3, %v1357_v29  ;;  %v653_v5 = vpop.f32.mrb[29].mxu0 }
 0x157   : > { %v654_v8 = vadd.f32 %v1357_v29, %v653_v5  ;;  %v1058_v9 = vpop.f32.mrb[30].mxu0  ;;  %1076 = vmatprep.subr.bf16.mxu1 %v1075_v2 }
 0x158   : > { %v665_v57 = vadd.f32 %v1058_v9, %v1357_v29  ;;  %v656_v10 = vpop.f32.mrb[31].mxu0  ;;  %1078 = vmatpush3.bf16.msra.mxu1 %v1381_v7  ;;  %v698_v56 = vmax.f32 %v662_v4, 0.0  ;;  %v703_v7 = vld [vmem:[%s1350_s8 + $0x18] sm:$0xff] }
 0x159   : > { %v657_v11 = vadd.f32 %v1357_v29, %v656_v10  ;;  %1080 = vmatprep.subr.bf16.mxu1 %v1079_v1  ;;  %v696_v13 = vmax.f32 %v654_v8, 0.0  ;;  %v702_v29 = vld [vmem:[%s1350_s8 + $0x10] sm:$0xff] }
 0x15a   : > { %v699_v12 = vmax.f32 %v665_v57, 0.0 }
 0x15b   : > { %v697_v14 = vmax.f32 %v657_v11, 0.0 }
 0x15c   : > { %v1087_v15 = vpack.c.bf16 %v699_v12, %v698_v56  ;;  %1082 = vmatpush3.bf16.msra.mxu1 %v1379_v6  ;;  %v1228_v6 = vmov (!%p943_p12), 0.0  }
 0x15d   : > { %v1083_v16 = vpack.c.bf16 %v697_v14, %v696_v13  ;;  %783 = vst [vmem:[%s1326_s27] sm:$0xff] (!%p943_p12), %v1228_v6  ;;  %784 = vst [vmem:[%s1326_s27 + $0x8] sm:$0xff] (!%p943_p12), %v1228_v6 }
 0x15f   : > { %1084 = vmatprep.subr.bf16.mxu1 %v1083_v16 }
 0x160   : > { %1086 = vmatpush3.bf16.msra.mxu1 %v1389_v21 }
 0x161   : > { %1088 = vmatprep.subr.bf16.mxu1 %v1087_v15 }
 0x164   : > { %1090 = vmatpush3.bf16.msra.mxu1 %v1387_v20 }
 0x167   : > { %769 = vmatmul.mubr.f32.vlgmr.msra.gmra.mrb[0].mxu1 %v700_v17 }
 0x168   : > { %773 = vmatprep.mubr.f32.mxu1 %v703_v7 }
 0x16b   : > { %774 = vmatmul.mubr.f32.gmra.mrb[2].mxu1 %v702_v29 }
 0x23a   : > { %v1005_v18 = vpop.f32.mrb[0].mxu1  ;;  %782 = sbr.rel (%p943_p12) target bundleno = 577 (0x241), region = 63 }
 0x23b   : > { %v1006_v19 = vpop.f32.mrb[1].mxu1 }
 0x23c   : > { %v1007_v22 = vadd.f32 %v1006_v19, %v1005_v18 }
 0x23e   : > { %v1008_v23 = vpop.f32.mrb[2].mxu1 }
 0x23f   : > { %v1009_v24 = vpop.f32.mrb[3].mxu1 }
 0x240   : > { %v1010_v25 = vadd.f32 %v1009_v24, %v1008_v23 }
 0x241 PF: > { %v785_v20 = vld [vmem:[%s1326_s27] sm:$0xff]  ;;  %v786_v21 = vld [vmem:[%s1326_s27 + $0x8] sm:$0xff] }
 0x242   : > { %v787_v26 = vadd.f32 %v1007_v22, %v785_v20  ;;  %v788_v27 = vadd.f32 %v1010_v25, %v786_v21 }
 0x244   : > { %789 = vst [vmem:[%s1326_s27] sm:$0xff] %v787_v26  ;;  %790 = vst [vmem:[%s1326_s27 + $0x8] sm:$0xff] %v788_v27 }
 0x245 PF: > { %s14_s21 = sadd.s32 1, %s1226_s21   ;;  %s1451_s15 = smov %s1206_s16 }
 0x246   : > { %p11_p13 = scmp.ge.s32.totalorder %s14_s21, 6   ;;  %s1452_s16 = smov %s1303_s26 }
 0x247   : > { %s1453_s17 = smov %s1218_s19  ;;  %s1454_s18 = smov %s1222_s20 }
 0x248   : > { %s1455_s19 = smov %s1458_s22  ;;  %s1456_s20 = smov %s1462_s23 }
 0x249   :  { %13 = sbr.rel (!%p11_p13) target bundleno = 4 (0x4), region = 107 }

// kernel: ensemble_forward.3
= control target key start
LH: loop header
LB: loop body
LE: loop exit
PB: predicated region body
PF: predicated region fallthrough
CT: control target
= control target key end

     0   :  { %12 = vsyncpa [#allocation3], 0  ;;  %v795_v1 = vmov 0.0   ;;  %vm796_vm0 = vmmov 0   ;;  %s1018_s0 = inlined_call_operand.vmem [shape: f32[2,16,128], index: 0, kind: input, shape index: {}]   ;;  %s1019_s1 = inlined_call_operand.vmem [shape: bf16[2,128,128], index: 1, kind: input, shape index: {}]   ;;  %s1020_s2 = inlined_call_operand.vmem [shape: f32[2,1,128], index: 2, kind: input, shape index: {}]   ;;  %s1021_s3 = inlined_call_operand.vmem [shape: bf16[2,128,128], index: 3, kind: input, shape index: {}]   ;;  %s1022_s4 = inlined_call_operand.vmem [shape: f32[2,1,128], index: 4, kind: input, shape index: {}]   ;;  %s1023_s5 = inlined_call_operand.hbm [shape: f32[2,128], index: 5, kind: output, shape index: {0}]   ;;  %s1024_s6 = inlined_call_operand.hbm [shape: f32[8,128], index: 6, kind: output, shape index: {1}]  }
   0x1   :  { %v715_v0 = vld [vmem:[%s1019_s1] sm:$0xff]   ;;  %619 = vmatprep.subr.bf16.mxu0 %v795_v1  ;;  %639 = vmatprep.subr.bf16.mxu1 %v795_v1  ;;  %v717_v3 = vld [vmem:[%s1019_s1 + $0x8] sm:$0xff]   ;;  %v719_v5 = vld [vmem:[%s1019_s1 + $0x10] sm:$0xff]  }
   0x2   :  { %v716_v2 = vld [vmem:[%s1021_s3] sm:$0xff]   ;;  %620 = vmatpush3.bf16.msra.mxu0 %v715_v0  ;;  %635 = vmatprep.mubr.msk.bf16.mxu0 %vm796_vm0, %v795_v1  ;;  %v718_v4 = vld [vmem:[%s1021_s3 + $0x8] sm:$0xff]   ;;  %v720_v6 = vld [vmem:[%s1021_s3 + $0x10] sm:$0xff]  }
   0x3   :  { %640 = vmatpush3.bf16.msra.mxu1 %v716_v2  ;;  %621 = vmatprep.subr.bf16.mxu0 %v795_v1  ;;  %v721_v7 = vld [vmem:[%s1019_s1 + $0x18] sm:$0xff]   ;;  %v723_v9 = vld [vmem:[%s1019_s1 + $0x20] sm:$0xff]   ;;  %v725_v11 = vld [vmem:[%s1019_s1 + $0x28] sm:$0xff]  }
   0x4   :  { %641 = vmatprep.subr.bf16.mxu1 %v795_v1  ;;  %655 = vmatprep.mubr.msk.bf16.mxu1 %vm796_vm0, %v795_v1  ;;  %v722_v8 = vld [vmem:[%s1021_s3 + $0x18] sm:$0xff]   ;;  %v724_v10 = vld [vmem:[%s1021_s3 + $0x20] sm:$0xff]   ;;  %v726_v12 = vld [vmem:[%s1021_s3 + $0x28] sm:$0xff]  }
   0x5   :  { %v727_v13 = vld [vmem:[%s1019_s1 + $0x30] sm:$0xff]   ;;  %v729_v15 = vld [vmem:[%s1019_s1 + $0x38] sm:$0xff]   ;;  %v25_v16 = vld [vmem:[%s1018_s0] sm:$0xff] }
   0x6   :  { %622 = vmatpush3.bf16.msra.mxu0 %v717_v3  ;;  %v728_v14 = vld [vmem:[%s1021_s3 + $0x30] sm:$0xff]   ;;  %v26_v17 = vld [vmem:[%s1018_s0 + $0x8] sm:$0xff]  ;;  %v730_v18 = vld [vmem:[%s1021_s3 + $0x38] sm:$0xff]  }
   0x7   :  { %642 = vmatpush3.bf16.msra.mxu1 %v718_v4  ;;  %623 = vmatprep.subr.bf16.mxu0 %v795_v1  ;;  %v29_v19 = vpack.c.bf16 %v26_v17, %v25_v16  ;;  %v731_v20 = vld [vmem:[%s1019_s1 + $0x40] sm:$0xff]   ;;  %v733_v22 = vld [vmem:[%s1019_s1 + $0x48] sm:$0xff]  }
   0x8   :  { %643 = vmatprep.subr.bf16.mxu1 %v795_v1  ;;  %v732_v21 = vld [vmem:[%s1021_s3 + $0x40] sm:$0xff]  }
   0xa   :  { %624 = vmatpush3.bf16.msra.mxu0 %v719_v5 }
   0xb   :  { %644 = vmatpush3.bf16.msra.mxu1 %v720_v6  ;;  %625 = vmatprep.subr.bf16.mxu0 %v795_v1 }
   0xc   :  { %645 = vmatprep.subr.bf16.mxu1 %v795_v1 }
   0xe   :  { %626 = vmatpush3.bf16.msra.mxu0 %v721_v7 }
   0xf   :  { %646 = vmatpush3.bf16.msra.mxu1 %v722_v8  ;;  %627 = vmatprep.subr.bf16.mxu0 %v795_v1 }
  0x10   :  { %647 = vmatprep.subr.bf16.mxu1 %v795_v1 }
  0x12   :  { %628 = vmatpush3.bf16.msra.mxu0 %v723_v9 }
  0x13   :  { %648 = vmatpush3.bf16.msra.mxu1 %v724_v10  ;;  %629 = vmatprep.subr.bf16.mxu0 %v795_v1 }
  0x14   :  { %649 = vmatprep.subr.bf16.mxu1 %v795_v1 }
  0x16   :  { %630 = vmatpush3.bf16.msra.mxu0 %v725_v11 }
  0x17   :  { %650 = vmatpush3.bf16.msra.mxu1 %v726_v12  ;;  %631 = vmatprep.subr.bf16.mxu0 %v795_v1 }
  0x18   :  { %651 = vmatprep.subr.bf16.mxu1 %v795_v1 }
  0x1a   :  { %632 = vmatpush3.bf16.msra.mxu0 %v727_v13 }
  0x1b   :  { %652 = vmatpush3.bf16.msra.mxu1 %v728_v14  ;;  %633 = vmatprep.subr.bf16.mxu0 %v795_v1 }
  0x1c   :  { %653 = vmatprep.subr.bf16.mxu1 %v795_v1 }
  0x1e   :  { %634 = vmatpush3.bf16.msra.mxu0 %v729_v15 }
  0x1f   :  { %654 = vmatpush3.bf16.msra.mxu1 %v730_v18  ;;  %659 = vmatprep.subr.bf16.mxu0 %v795_v1 }
  0x20   :  { %679 = vmatprep.subr.bf16.mxu1 %v795_v1 }
  0x21   :  { %636 = vmatmul.mubr.bf16.vlgmr.msra.gmra.mrb[0].mxu0 %v29_v19 }
  0x22   :  { %656 = vmatmul.mubr.bf16.vlgmr.msra.gmra.mrb[0].mxu1 %v29_v19  ;;  %660 = vmatpush3.bf16.msra.mxu0 %v731_v20 }
  0x23   :  { %13 = vsyncpa [#allocation5], 0  ;;  %680 = vmatpush3.bf16.msra.mxu1 %v732_v21  ;;  %661 = vmatprep.subr.bf16.mxu0 %v795_v1  ;;  %v734_v23 = vld [vmem:[%s1021_s3 + $0x48] sm:$0xff]   ;;  %v735_v24 = vld [vmem:[%s1019_s1 + $0x50] sm:$0xff]   ;;  %s797_s26 = smov [#allocation2]   ;;  %s798_s28 = smov [#allocation4]  }
  0x24   :  { %681 = vmatprep.subr.bf16.mxu1 %v795_v1  ;;  %675 = vmatprep.mubr.msk.bf16.mxu0 %vm796_vm0, %v795_v1  ;;  %v736_v25 = vld [vmem:[%s1021_s3 + $0x50] sm:$0xff]   ;;  %v737_v26 = vld [vmem:[%s1019_s1 + $0x58] sm:$0xff]   ;;  %v739_v28 = vld [vmem:[%s1019_s1 + $0x60] sm:$0xff]   ;;  %s491_s27 = sshll.u32 %s797_s26, 4  ;;  %s492_s27 = int_to_ptr.vmem [resolvable:$true] %s491_s27 }
  0x25   :  { %695 = vmatprep.mubr.msk.bf16.mxu1 %vm796_vm0, %v795_v1  ;;  %v738_v27 = vld [vmem:[%s1021_s3 + $0x58] sm:$0xff]   ;;  %v740_v29 = vld [vmem:[%s1021_s3 + $0x60] sm:$0xff]   ;;  %v741_v30 = vld [vmem:[%s1019_s1 + $0x68] sm:$0xff]   ;;  %p752_p1 = scmp.lt.s32.totalorder %s492_s27, %s492_s27 }
  0x26   :  { %662 = vmatpush3.bf16.msra.mxu0 %v733_v22  ;;  %v742_v31 = vld [vmem:[%s1021_s3 + $0x68] sm:$0xff]   ;;  %v743_v32 = vld [vmem:[%s1019_s1 + $0x70] sm:$0xff]   ;;  %v745_v34 = vld [vmem:[%s1019_s1 + $0x78] sm:$0xff]  }
  0x27   :  { %682 = vmatpush3.bf16.msra.mxu1 %v734_v23  ;;  %663 = vmatprep.subr.bf16.mxu0 %v795_v1  ;;  %v744_v33 = vld [vmem:[%s1021_s3 + $0x70] sm:$0xff]   ;;  %v28_v36 = vld [vmem:[%s1018_s0 + $0x18] sm:$0xff]  ;;  %v513_v39 = vld [vmem:[%s1020_s2] ss:$0 sm:$0xff] }
  0x28   :  { %683 = vmatprep.subr.bf16.mxu1 %v795_v1  ;;  %v27_v35 = vld [vmem:[%s1018_s0 + $0x10] sm:$0xff]  ;;  %v746_v37 = vld [vmem:[%s1021_s3 + $0x78] sm:$0xff]   ;;  %v548_v40 = vld [vmem:[%s1020_s2 + $0x1] ss:$0 sm:$0xff]  ;;  %s501_s2 = sshll.u32 %s798_s28, 4  ;;  %s502_s2 = int_to_ptr.vmem [resolvable:$true] %s501_s2 }
  0x29   :  { %v30_v38 = vpack.c.bf16 %v28_v36, %v27_v35  ;;  %v699_v41 = vadd.f32 %v548_v40, %v513_v39  ;;  %v522_v42 = vld [vmem:[%s1022_s4] ss:$0 sm:$0xff]  ;;  %v574_v43 = vld [vmem:[%s1022_s4 + $0x1] ss:$0 sm:$0xff]  ;;  %s747_s4 = scalar_lea.vmem %s492_s27, 32 }
  0x2a   :  { %664 = vmatpush3.bf16.msra.mxu0 %v735_v24  ;;  %v701_v45 = vadd.f32 %v574_v43, %v522_v42  ;;  %p748_p0 = scmp.ne.s32.totalorder %s492_s27, %s747_s4  ;;  %p753_p2 = scmp.lt.s32.totalorder %s747_s4, %s747_s4 }
  0x2b   :  { %684 = vmatpush3.bf16.msra.mxu1 %v736_v25  ;;  %665 = vmatprep.subr.bf16.mxu0 %v795_v1 }
  0x2c   :  { %685 = vmatprep.subr.bf16.mxu1 %v795_v1  ;;  %p754_p3 = por %p753_p2, %p752_p1 }
  0x2e   :  { %666 = vmatpush3.bf16.msra.mxu0 %v737_v26  ;;  %p755_p4 = pnand %p754_p3, %p748_p0 }
  0x2f   :  { %686 = vmatpush3.bf16.msra.mxu1 %v738_v27  ;;  %667 = vmatprep.subr.bf16.mxu0 %v795_v1 }
  0x30   :  { %687 = vmatprep.subr.bf16.mxu1 %v795_v1 }
  0x32   :  { %668 = vmatpush3.bf16.msra.mxu0 %v739_v28 }
  0x33   :  { %688 = vmatpush3.bf16.msra.mxu1 %v740_v29  ;;  %669 = vmatprep.subr.bf16.mxu0 %v795_v1 }
  0x34   :  { %689 = vmatprep.subr.bf16.mxu1 %v795_v1 }
  0x36   :  { %670 = vmatpush3.bf16.msra.mxu0 %v741_v30 }
  0x37   :  { %690 = vmatpush3.bf16.msra.mxu1 %v742_v31  ;;  %671 = vmatprep.subr.bf16.mxu0 %v795_v1 }
  0x38   :  { %691 = vmatprep.subr.bf16.mxu1 %v795_v1 }
  0x3a   :  { %672 = vmatpush3.bf16.msra.mxu0 %v743_v32 }
  0x3b   :  { %692 = vmatpush3.bf16.msra.mxu1 %v744_v33  ;;  %673 = vmatprep.subr.bf16.mxu0 %v795_v1 }
  0x3c   :  { %693 = vmatprep.subr.bf16.mxu1 %v795_v1 }
  0x3e   :  { %674 = vmatpush3.bf16.msra.mxu0 %v745_v34 }
  0x3f   :  { %694 = vmatpush3.bf16.msra.mxu1 %v746_v37 }
  0x41   :  { %676 = vmatmul.mubr.bf16.vlgmr.msra.gmra.mrb[0].mxu0 %v30_v38 }
  0x42   :  { %696 = vmatmul.mubr.bf16.vlgmr.msra.gmra.mrb[0].mxu1 %v30_v38 }
 0x114   :  { %v360_v44 = vpop.f32.mrb[0].mxu0 }
 0x115   :  { %v700_v46 = vadd.f32 %v699_v41, %v360_v44  ;;  %v473_v47 = vpop.f32.mrb[0].mxu1  ;;  %v677_v48 = vpop.f32.mrb[1].mxu0 }
 0x116   :  { %v697_v49 = vpop.f32.mrb[1].mxu1  ;;  %v363_v50 = vpop.f32.mrb[2].mxu0 }
 0x117   :  { %v475_v51 = vpop.f32.mrb[2].mxu1  ;;  %v678_v52 = vpop.f32.mrb[3].mxu0  ;;  %v480_v53 = vmul.f32 0.5, %v700_v46 }
 0x118   :  { %v702_v54 = vadd.f32 %v701_v45, %v475_v51  ;;  %v698_v55 = vpop.f32.mrb[3].mxu1 }
 0x119   :  { %481 = vst [vmem:[#allocation2] sm:$0x3] %v480_v53 }
 0x11a   :  { %v483_v56 = vmul.f32 0.5, %v702_v54 }
 0x11b   :  { %758 = shalt.err (!%p755_p4)
}
 0x11c   :  { %s759_s7 = scalar_lea.hbm %s1023_s5, 32 }
 0x11d   :  { %p760_p5 = scmp.ne.s32.totalorder %s1023_s5, %s759_s7  ;;  %p763_p6 = scmp.lt.u32.totalorder %s759_s7, %s1023_s5 }
 0x11f   :  { %p765_p7 = pnand %p763_p6, %p760_p5 }
 0x121   :  { %768 = shalt.err (!%p765_p7)
}
 0x122   :  { %494 = dma.vmem_to_hbm [thread:$0]  %s492_s27, 32, %s1023_s5, [#allocation3]   ;;  %484 = vst [vmem:[#allocation4] sm:$0xff] %v483_v56 }
 0x123   :  { %s769_s14 = scalar_lea.vmem %s502_s2, 128  ;;  %p774_p9 = scmp.lt.s32.totalorder %s502_s2, %s502_s2 }
 0x124   :  { %p770_p8 = scmp.ne.s32.totalorder %s502_s2, %s769_s14  ;;  %p775_p10 = scmp.lt.s32.totalorder %s769_s14, %s769_s14 }
 0x126   :  { %p776_p11 = por %p775_p10, %p774_p9 }
 0x128   :  { %p777_p12 = pnand %p776_p11, %p770_p8 }
 0x12a   :  { %780 = shalt.err (!%p777_p12)
}
 0x12b   :  { %s781_s17 = scalar_lea.hbm %s1024_s6, 128 }
 0x12c   :  { %p782_p13 = scmp.ne.s32.totalorder %s1024_s6, %s781_s17  ;;  %p785_p0 = scmp.lt.u32.totalorder %s781_s17, %s1024_s6 }
 0x12e   :  { %p787_p1 = pnand %p785_p0, %p782_p13 }
 0x130   :  { %790 = shalt.err (!%p787_p1)
}
 0x131   :  { %504 = dma.vmem_to_hbm [thread:$0]  %s502_s2, 128, %s1024_s6, [#allocation5]  }
 0x132   :  { %791 = dma.done.wait [#allocation3], 32  }
 0x133   :  { %792 = vsyncadd [#allocation3], 4294967264 }
 0x134   :  { %793 = dma.done.wait [#allocation5], 128  }
 0x135   :  { %794 = vsyncadd [#allocation5], 4294967168 }
 0x136   :  { %511 = vsyncpa [#allocation3], 1 }
 0x137   :  { %512 = vsyncpa [#allocation5], 1 }

</bundles_post_ra>
